<compile_context>
chip_gen: v5e
topology: v5e:2x2
jax: 0.10.0
libtpu: 0.0.40
codegen_flags: <defaults>
</compile_context>

<pallas_src>
import functools

import jax
import jax.numpy as jnp
from jax.experimental import pallas as pl
from jax.experimental.pallas import tpu as pltpu


def _round_up(x, m):
    return ((x + m - 1) // m) * m


def _se_kernel(x_ref, w1_ref, w2_ref, o_ref, acc_ref, *, inv_hw, n_lane_chunks):
    """One grid step: accumulate spatial partial sums; finalize GAP+FC on last tile.

    x_ref:   (1, C, TS)   lane-dense spatial tile of one batch element
    w1_ref:  (C, ratio)   first Linear weight, already transposed (y @ w1_t)
    w2_ref:  (ratio, C)   second Linear weight, already transposed
    o_ref:   (1, 1, C)    per-batch SE attention vector
    acc_ref: (C, 128)     f32 partial-sum scratch (lane-dense accumulator)
    """
    s = pl.program_id(1)

    @pl.when(s == 0)
    def _init():
        acc_ref[...] = jnp.zeros_like(acc_ref)

    xb = x_ref[0]  # (C, TS)
    # Lane-aligned 128-wide static slices -> pure VPU adds, accumulate in f32.
    part = xb[:, 0:128].astype(jnp.float32)
    for j in range(1, n_lane_chunks):
        part = part + xb[:, j * 128:(j + 1) * 128].astype(jnp.float32)
    acc_ref[...] += part

    @pl.when(s == pl.num_programs(1) - 1)
    def _finalize():
        # Single cross-lane reduce of the partial sums -> per-channel mean.
        total = jnp.sum(acc_ref[...], axis=1)            # (C,)
        y = (total * inv_hw).reshape(1, -1)              # (1, C) GAP result
        h = jnp.maximum(
            jnp.dot(y, w1_ref[...], preferred_element_type=jnp.float32), 0.0)
        z = jnp.dot(h, w2_ref[...], preferred_element_type=jnp.float32)
        o_ref[...] = jax.nn.sigmoid(z).reshape(o_ref.shape).astype(o_ref.dtype)


def se_forward(x_nchw, w1, w2):
    """SE.forward equivalent.

    x_nchw: (B, C, H, W)      input, PyTorch NCHW layout
    w1:     (ratio, C)        nn.Linear(C, ratio, bias=False).weight
    w2:     (C, ratio)        nn.Linear(ratio, C, bias=False).weight
    Returns (B, C, 1, 1) attention weights (same semantics as the module).
    """
    B, C, H, W = x_nchw.shape
    ratio = w1.shape[0]
    assert w1.shape == (ratio, C), w1.shape
    assert w2.shape == (C, ratio), w2.shape

    S = H * W
    itemsize = jnp.dtype(x_nchw.dtype).itemsize

    # Spatial (lane) tile: multiple of 128, capped so a double-buffered input
    # tile stays <= ~8 MiB even for large C (safe on v7x's smaller VMEM).
    max_ts_by_vmem = max(128, ((4 * 1024 * 1024) // max(C * itemsize, 1)) // 128 * 128)
    TS = min(2048, max_ts_by_vmem, _round_up(S, 128))
    S_pad = _round_up(S, TS)

    # Free reshape (no transpose): spatial axis -> lanes.  Zero-pad the tail
    # tile; zeros do not perturb the sum (we divide by the true H*W).
    x_flat = x_nchw.reshape(B, C, S)
    if S_pad != S:
        x_flat = jnp.pad(x_flat, ((0, 0), (0, 0), (0, S_pad - S)))

    # Pre-transpose the Linear weights so the kernel does plain row @ mat.
    w1_t = jnp.transpose(w1).astype(jnp.float32)  # (C, ratio)
    w2_t = jnp.transpose(w2).astype(jnp.float32)  # (ratio, C)

    n_s_tiles = S_pad // TS
    kernel = functools.partial(
        _se_kernel, inv_hw=1.0 / float(S), n_lane_chunks=TS // 128)

    out = pl.pallas_call(
        kernel,
        out_shape=jax.ShapeDtypeStruct((B, 1, C), x_nchw.dtype),
        grid_spec=pltpu.PrefetchScalarGridSpec(
            num_scalar_prefetch=0,
            grid=(B, n_s_tiles),
            in_specs=[
                pl.BlockSpec((1, C, TS), lambda b, s: (b, 0, s)),
                pl.BlockSpec((C, ratio), lambda b, s: (0, 0)),
                pl.BlockSpec((ratio, C), lambda b, s: (0, 0)),
            ],
            out_specs=pl.BlockSpec((1, 1, C), lambda b, s: (b, 0, 0)),
            scratch_shapes=[pltpu.VMEM((C, 128), jnp.float32)],
        ),
        compiler_params=pltpu.CompilerParams(
            # batch axis parallel (megacore); spatial axis is a reduction.
            dimension_semantics=("parallel", "arbitrary"),
        ),
    )(x_flat, w1_t, w2_t)

    return out.reshape(B, C, 1, 1)


def _reference(x, w1, w2):
    """Pure-JAX reference for correctness checking."""
    B, C = x.shape[:2]
    y = jnp.mean(x.astype(jnp.float32), axis=(2, 3))           # (B, C)
    h = jnp.maximum(y @ jnp.transpose(w1).astype(jnp.float32), 0.0)
    z = jax.nn.sigmoid(h @ jnp.transpose(w2).astype(jnp.float32))
    return z.reshape(B, C, 1, 1).astype(x.dtype)


if __name__ == "__main__":
    key = jax.random.PRNGKey(0)
    k_x, k_w1, k_w2 = jax.random.split(key, 3)

    # Small shapes consistent with the module (default ratio=16).
    B, C, H, W = 2, 64, 16, 16
    ratio = 16

    x = jax.random.normal(k_x, (B, C, H, W), dtype=jnp.float32)
    w1 = 0.1 * jax.random.normal(k_w1, (ratio, C), dtype=jnp.float32)  # Linear(C, ratio).weight
    w2 = 0.1 * jax.random.normal(k_w2, (C, ratio), dtype=jnp.float32)  # Linear(ratio, C).weight

    out = se_forward(x, w1, w2)
    out = jax.block_until_ready(out)

    ref = _reference(x, w1, w2)

    assert out.shape == (B, C, 1, 1), out.shape
    assert jnp.allclose(out, ref, atol=1e-5, rtol=1e-5), \
        float(jnp.max(jnp.abs(out - ref)))

    print("KERNEL_OK")
</pallas_src>

<mosaic_0001>
module attributes {stable_mosaic.version = 11 : i64} {
  func.func @_se_kernel(%arg0: i32, %arg1: i32, %arg2: memref<1x64x256xf32, #tpu.memory_space<vmem>>, %arg3: memref<64x16xf32, #tpu.memory_space<vmem>>, %arg4: memref<16x64xf32, #tpu.memory_space<vmem>>, %arg5: memref<1x1x64xf32, #tpu.memory_space<vmem>>, %arg6: memref<64x128xf32, #tpu.memory_space<vmem>>) attributes {dimension_semantics = [#tpu.dimension_semantics<parallel>, #tpu.dimension_semantics<arbitrary>], iteration_bounds = array<i64: 2, 1>, scalar_prefetch = 0 : i64, scratch_operands = 1 : i64, tpu.core_type = #tpu.core_type<tc>, window_params = [{transform_indices = @transform_0, window_bounds = array<i64: 1, 64, 256>}, {pipeline_mode = #tpu.pipeline_mode<synchronous>, transform_indices = @transform_1, window_bounds = array<i64: 64, 16>}, {pipeline_mode = #tpu.pipeline_mode<synchronous>, transform_indices = @transform_2, window_bounds = array<i64: 16, 64>}, {transform_indices = @transform_3, window_bounds = array<i64: 1, 1, 64>}]} {
    %c0_i32 = arith.constant 0 : i32
    %0 = arith.cmpi eq, %arg1, %c0_i32 : i32
    %1 = arith.extui %0 : i1 to i32
    %c0_i32_0 = arith.constant 0 : i32
    %2 = arith.cmpi ne, %1, %c0_i32_0 : i32
    scf.if %2 {
      %cst = arith.constant 0.000000e+00 : f32
      %14 = vector.broadcast %cst : f32 to vector<64x128xf32>
      %c0_9 = arith.constant 0 : index
      %c0_10 = arith.constant 0 : index
      %15 = vector.load %arg6[%c0_9, %c0_10] : memref<64x128xf32, #tpu.memory_space<vmem>>, vector<64x128xf32>
      tpu.vector_store %arg6[%c0_9, %c0_10], %14 {strides = array<i32>} : memref<64x128xf32, #tpu.memory_space<vmem>>, vector<64x128xf32>,
    } else {
    }
    %c0 = arith.constant 0 : index
    %c0_1 = arith.constant 0 : index
    %c0_2 = arith.constant 0 : index
    %3 = vector.load %arg2[%c0, %c0_1, %c0_2] : memref<1x64x256xf32, #tpu.memory_space<vmem>>, vector<1x64x256xf32>
    %4 = vector.shape_cast %3 : vector<1x64x256xf32> to vector<64x256xf32>
    %5 = vector.extract_strided_slice %4 {offsets = [0, 0], sizes = [64, 128], strides = [1, 1]} : vector<64x256xf32> to vector<64x128xf32>
    %6 = vector.extract_strided_slice %4 {offsets = [0, 128], sizes = [64, 128], strides = [1, 1]} : vector<64x256xf32> to vector<64x128xf32>
    %7 = arith.addf %5, %6 : vector<64x128xf32>
    %c0_3 = arith.constant 0 : index
    %c0_4 = arith.constant 0 : index
    %8 = vector.load %arg6[%c0_3, %c0_4] : memref<64x128xf32, #tpu.memory_space<vmem>>, vector<64x128xf32>
    %9 = arith.addf %8, %7 : vector<64x128xf32>
    %c0_5 = arith.constant 0 : index
    %c0_6 = arith.constant 0 : index
    %10 = vector.load %arg6[%c0_5, %c0_6] : memref<64x128xf32, #tpu.memory_space<vmem>>, vector<64x128xf32>
    tpu.vector_store %arg6[%c0_5, %c0_6], %9 {strides = array<i32>} : memref<64x128xf32, #tpu.memory_space<vmem>>, vector<64x128xf32>,
    %c0_i32_7 = arith.constant 0 : i32
    %11 = arith.cmpi eq, %arg1, %c0_i32_7 : i32
    %12 = arith.extui %11 : i1 to i32
    %c0_i32_8 = arith.constant 0 : i32
    %13 = arith.cmpi ne, %12, %c0_i32_8 : i32
    scf.if %13 {
      %c0_9 = arith.constant 0 : index
      %c0_10 = arith.constant 0 : index
      %14 = vector.load %arg6[%c0_9, %c0_10] : memref<64x128xf32, #tpu.memory_space<vmem>>, vector<64x128xf32>
      %cst = arith.constant dense<0.000000e+00> : vector<64xf32>
      %15 = vector.multi_reduction <add>, %14, %cst [1] : vector<64x128xf32> to vector<64xf32>
      %cst_11 = arith.constant 3.906250e-03 : f32
      %16 = vector.broadcast %cst_11 : f32 to vector<64xf32>
      %17 = arith.mulf %15, %16 : vector<64xf32>
      %18 = vector.shape_cast %17 : vector<64xf32> to vector<1x64xf32>
      %c0_12 = arith.constant 0 : index
      %c0_13 = arith.constant 0 : index
      %19 = vector.load %arg3[%c0_12, %c0_13] : memref<64x16xf32, #tpu.memory_space<vmem>>, vector<64x16xf32>
      %cst_14 = arith.constant dense<0.000000e+00> : vector<1x16xf32>
      %20 = tpu.matmul %18, %19, %cst_14 {dimension_numbers = #tpu.dot_dimension_numbers<[1], [0], [0], [1], [0, 0, 1, 1], [], []>} : vector<1x64xf32>, vector<64x16xf32>, vector<1x16xf32> -> vector<1x16xf32>
      %cst_15 = arith.constant 0.000000e+00 : f32
      %21 = vector.broadcast %cst_15 : f32 to vector<1x16xf32>
      %22 = arith.maximumf %20, %21 : vector<1x16xf32>
      %c0_16 = arith.constant 0 : index
      %c0_17 = arith.constant 0 : index
      %23 = vector.load %arg4[%c0_16, %c0_17] : memref<16x64xf32, #tpu.memory_space<vmem>>, vector<16x64xf32>
      %cst_18 = arith.constant dense<0.000000e+00> : vector<1x64xf32>
      %24 = tpu.matmul %22, %23, %cst_18 {dimension_numbers = #tpu.dot_dimension_numbers<[1], [0], [0], [1], [0, 0, 1, 1], [], []>} : vector<1x16xf32>, vector<16x64xf32>, vector<1x64xf32> -> vector<1x64xf32>
      %25 = arith.negf %24 : vector<1x64xf32>
      %26 = math.exp %25 : vector<1x64xf32>
      %cst_19 = arith.constant 1.000000e+00 : f32
      %27 = vector.broadcast %cst_19 : f32 to vector<1x64xf32>
      %28 = arith.addf %27, %26 : vector<1x64xf32>
      %29 = arith.divf %27, %28 : vector<1x64xf32>
      %30 = vector.shape_cast %29 : vector<1x64xf32> to vector<1x1x64xf32>
      %c0_20 = arith.constant 0 : index
      %c0_21 = arith.constant 0 : index
      %c0_22 = arith.constant 0 : index
      %31 = vector.load %arg5[%c0_20, %c0_21, %c0_22] : memref<1x1x64xf32, #tpu.memory_space<vmem>>, vector<1x1x64xf32>
      tpu.vector_store %arg5[%c0_20, %c0_21, %c0_22], %30 {strides = array<i32>} : memref<1x1x64xf32, #tpu.memory_space<vmem>>, vector<1x1x64xf32>,
    } else {
    }
    return
  }
  func.func @transform_0(%arg0: i32, %arg1: i32) -> (i32, i32, i32) {
    %c0_i32 = arith.constant 0 : i32
    %c0_i32_0 = arith.constant 0 : i32
    return %arg0, %c0_i32, %arg1 : i32, i32, i32
  }
  func.func @transform_1(%arg0: i32, %arg1: i32) -> (i32, i32) {
    %c0_i32 = arith.constant 0 : i32
    %c0_i32_0 = arith.constant 0 : i32
    %c0_i32_1 = arith.constant 0 : i32
    return %c0_i32, %c0_i32_0 : i32, i32
  }
  func.func @transform_2(%arg0: i32, %arg1: i32) -> (i32, i32) {
    %c0_i32 = arith.constant 0 : i32
    %c0_i32_0 = arith.constant 0 : i32
    %c0_i32_1 = arith.constant 0 : i32
    return %c0_i32, %c0_i32_0 : i32, i32
  }
  func.func @transform_3(%arg0: i32, %arg1: i32) -> (i32, i32, i32) {
    %c0_i32 = arith.constant 0 : i32
    %c0_i32_0 = arith.constant 0 : i32
    %c0_i32_1 = arith.constant 0 : i32
    return %arg0, %c0_i32, %c0_i32_0 : i32, i32, i32
  }
}

</mosaic_0001>

<bundles_post_ra>
// kernel: tpu_custom_call.1
= control target key start
LH: loop header
LB: loop body
LE: loop exit
PB: predicated region body
PF: predicated region fallthrough
CT: control target
= control target key end

     0   :  { %8 = vsyncpa [#allocation4], 0  ;;  %s880_s0 = inlined_call_operand.hbm [shape: f32[2,64,256], index: 0, kind: input, shape index: {}]   ;;  %s881_s1 = inlined_call_operand.vmem [shape: f32[64,16], index: 1, kind: input, shape index: {}]   ;;  %s882_s2 = inlined_call_operand.vmem [shape: f32[16,64], index: 2, kind: input, shape index: {}]   ;;  %s883_s3 = inlined_call_operand.hbm [shape: f32[2,1,64], index: 3, kind: output, shape index: {}]  }
   0x1   :  { %10 = vsyncpa [#allocation4 + $0x1], 0 }
   0x2   :  { %11 = vsyncpa [#allocation5], 0 }
   0x3   :  { %13 = vsyncpa [#allocation5 + $0x1], 0  ;;  %s729_s12 = smov 0   ;;  %s731_s13 = smov 0  }
   0x4   :  { %s733_s14 = smov 0   ;;  %s735_s15 = smov 0  }
   0x5   :  { %s737_s16 = smov 0   ;;  %s739_s17 = smov 0  }
   0x6 LB: > { %s510_s18 = sadd.s32 4294967295, %s705_s17   ;;  %s511_s19 = sadd.s32 4294967294, %s705_s17   ;;  %s705_s17 = sphi %s739_s17, %s19_s17   ;;  %s701_s16 = sphi %s737_s16, %s892_s16   ;;  %s697_s15 = sphi %s735_s15, %s891_s15   ;;  %s693_s14 = sphi %s733_s14, %s890_s14   ;;  %s689_s13 = sphi %s731_s13, %s889_s13   ;;  %s685_s12 = sphi %s729_s12, %s888_s12  }
   0x7   : > { %s31_s20 = sadd.s32 1, %s701_s16  ;;  %s40_s21 = sadd.s32 1, %s693_s14 }
   0x8   : > { %p33_p0 = scmp.ge.s32.totalorder %s31_s20, 2  ;;  %p47_p1 = scmp.ne.s32.totalorder %s693_s14, %s689_s13 }
   0x9   : > { %p48_p2 = scmp.eq.s32.totalorder %s705_s17, 0  ;;  %p53_p3 = scmp.ne.s32.totalorder %s689_s13, %s685_s12 }
   0xa   : > { %s894_s20 = smov (%p33_p0, %s31_s20), 0  ;;  %p54_p5 = scmp.eq.s32.totalorder %s510_s18, 0 }
   0xb   : > { %p770_p4 = por %p48_p2, %p47_p1  ;;  %s35_s23 = ssub.s32 %s701_s16, %s894_s20 }
   0xc   : > { %p119_p6 = scmp.eq.s32.totalorder %s510_s18, 1  ;;  %p38_p7 = scmp.eq.s32.totalorder %s35_s23, 0 }
   0xd   : > { %p776_p8 = por %p54_p5, %p53_p3  ;;  %p125_p10 = scmp.eq.s32.totalorder %s511_s19, 1 }
   0xe   : > { %p780_p9 = por %p119_p6, %p47_p1  ;;  %p513_p12 = scmp.ge.s32.totalorder %s705_s17, 2 }
   0xf   : > { %s785_s26 = scalar_select %p38_p7, %s693_s14, %s40_s21  }
  0x10   : > { %p787_p11 = por %p125_p10, %p53_p3  ;;  %p537_p13 = scmp.lt.s32.totalorder %s705_s17, 2 }
  0x11   : > { %s151_s28 = sand.u32 1, %s693_s14   ;;  %s524_s30 = sshll.u32 %s701_s16, 7 }
  0x12   : > { %s514_s29 = sshll.u32 %s151_s28, 7  ;;  %s162_s6 = scalar_lea.hbm %s880_s0, %s524_s30 }
  0x13   : > { %s155_s7 = scalar_lea.vmem [#allocation3], %s514_s29  ;;  %s163_s9 = sshll.u32 %s162_s6, 4  ;;  %s164_s9 = int_to_ptr.hbm [resolvable:$true] %s163_s9 }
  0x14   : > { %s165_s8 = sshll.u32 %s155_s7, 4  ;;  %p530_p0 = pnand %p537_p13, %p770_p4  ;;  %s166_s8 = int_to_ptr.vmem [resolvable:$true] %s165_s8 }
  0x15   : > { %p517_p1 = scmp.ge.s32.totalorder %s705_s17, 1  ;;  %s152_s10 = scalar_lea.sflag [#allocation4], %s151_s28 }
  0x16   : > { %s707_s11 = smov 256   ;;  %s708_s18 = smov 16  }
  0x17   : > { %532 = dma.hbm_to_vmem [thread:$0]  (!%p530_p0), %s164_s9, 2048, %s166_s8, %s152_s10, %s707_s11, %s707_s11, %s708_s18  }
  0x18   : > { %p173_p2 = scmp.lt.s32.totalorder %s705_s17, 3 }
  0x1a   : > { %p174_p3 = pnand %p517_p1, %p173_p2 }
  0x1b   : > { %s803_s19 = sand.u32 (!%p174_p3), 1, %s689_s13  }
  0x1c   : > { %177 = sbr.rel (%p174_p3) target bundleno = 460 (0x1cc), region = 32  ;;  %s518_s21 = sshll.u32 (!%p174_p3), %s803_s19, 7 }
  0x1d   : > { %s180_s23 = scalar_lea.sflag (!%p174_p3), [#allocation4], %s803_s19  ;;  %s183_s29 = scalar_lea.vmem (!%p174_p3), [#allocation3], %s518_s21 }
  0x21   : > { %676 = dma.done.wait (%p776_p8), %s180_s23, 2048  }
  0x22   : > { %678 = vsyncadd (%p776_p8), %s180_s23, 4294965248  ;;  %v219_v0 = vld [vmem:[%s183_s29] sm:$0xff]  ;;  %v220_v1 = vld [vmem:[%s183_s29 + $0x8] sm:$0xff]  ;;  %v318_v32 = vlaneseq  ;;  %vm323_vm0 = vcmask 130112   ;;  %vm327_vm1 = vcmask 195712   ;;  %vm331_vm2 = vcmask 261312   ;;  %s429_s6 = scalar_lea.hbm %s883_s3, %s697_s15 }
  0x23   : > { %v223_v2 = vld [vmem:[%s183_s29 + $0x20] sm:$0xff]  ;;  %v235_v3 = vadd.f32 %v220_v1, %v219_v0  ;;  %v224_v4 = vld [vmem:[%s183_s29 + $0x28] sm:$0xff]  ;;  %v221_v9 = vld [vmem:[%s183_s29 + $0x10] sm:$0xff]  ;;  %vm335_vm3 = vcmask 326912   ;;  %vm339_vm4 = vcmask 392512   ;;  %vm343_vm5 = vcmask 458112  }
  0x24   : > { %v227_v5 = vld [vmem:[%s183_s29 + $0x40] sm:$0xff]  ;;  %v228_v6 = vld [vmem:[%s183_s29 + $0x48] sm:$0xff]  ;;  %v237_v7 = vadd.f32 %v224_v4, %v223_v2  ;;  %v222_v10 = vld [vmem:[%s183_s29 + $0x18] sm:$0xff]  ;;  %v319_v36 = vand.u32 127, %v318_v32  ;;  %vm347_vm6 = vcmask 523712   ;;  %vm349_vm7 = vcmask 523264  }
  0x25   : > { %v239_v8 = vadd.f32 %v228_v6, %v227_v5  ;;  %278 = vadd.xlane.f32.xlu0 %v235_v3  ;;  %v225_v11 = vld [vmem:[%s183_s29 + $0x30] sm:$0xff]  ;;  %v226_v12 = vld [vmem:[%s183_s29 + $0x38] sm:$0xff]  ;;  %v236_v15 = vadd.f32 %v222_v10, %v221_v9  ;;  %v231_v18 = vld [vmem:[%s183_s29 + $0x60] sm:$0xff]  ;;  %vm375_vm8 = vcmask 130048   ;;  %s205_s7 = scalar_lea.vmem [#allocation6], %s803_s19  ;;  %s433_s9 = sshll.u32 %s429_s6, 4  ;;  %s434_s9 = int_to_ptr.hbm [resolvable:$true] %s433_s9 }
  0x26   : > { %282 = vadd.xlane.f32.xlu1 %v237_v7  ;;  %v229_v13 = vld [vmem:[%s183_s29 + $0x50] sm:$0xff]  ;;  %v230_v14 = vld [vmem:[%s183_s29 + $0x58] sm:$0xff]  ;;  %v238_v16 = vadd.f32 %v226_v12, %v225_v11  ;;  %v232_v19 = vld [vmem:[%s183_s29 + $0x68] sm:$0xff]  ;;  %v321_v38 = vadd.s32 4294967288, %v319_v36  ;;  %v325_v39 = vadd.s32 4294967280, %v319_v36  ;;  %v329_v42 = vadd.s32 4294967272, %v319_v36 }
  0x27   : > { %286 = vadd.xlane.f32.xlu2 %v239_v8  ;;  %v240_v17 = vadd.f32 %v230_v14, %v229_v13  ;;  %v233_v20 = vld [vmem:[%s183_s29 + $0x70] sm:$0xff]  ;;  %v234_v21 = vld [vmem:[%s183_s29 + $0x78] sm:$0xff]  ;;  %v241_v22 = vadd.f32 %v232_v19, %v231_v18  ;;  %v307_v26 = vld [vmem:[%s881_s1 + $0x28] sm:$0xff]  ;;  %v333_v46 = vadd.s32 4294967264, %v319_v36  ;;  %v337_v53 = vadd.s32 4294967256, %v319_v36  ;;  %s431_s8 = sshll.u32 %s205_s7, 4  ;;  %s432_s8 = int_to_ptr.vmem [resolvable:$true] %s431_s8 }
  0x28   : > { %v242_v23 = vadd.f32 %v234_v21, %v233_v20  ;;  %v309_v24 = vld [vmem:[%s881_s1 + $0x38] sm:$0xff]  ;;  %v308_v25 = vld [vmem:[%s881_s1 + $0x30] sm:$0xff]  ;;  %v306_v27 = vld [vmem:[%s881_s1 + $0x20] sm:$0xff]  ;;  %v341_v59 = vadd.s32 4294967248, %v319_v36  ;;  %v345_v62 = vadd.s32 4294967240, %v319_v36  ;;  %vm418_vm12 = vcmask 516096  }
  0x29   : > { %360 = vmatpush.msra.mxu0 %v309_v24  ;;  %v305_v28 = vld [vmem:[%s881_s1 + $0x18] sm:$0xff]  ;;  %v304_v29 = vld [vmem:[%s881_s1 + $0x10] sm:$0xff]  ;;  %v303_v30 = vld [vmem:[%s881_s1 + $0x8] sm:$0xff]  ;;  %s421_s15 = scalar_lea.sflag [#allocation5], %s803_s19  ;;  %s637_s10 = sshra.s32 %s434_s9, 4  ;;  %s638_s10 = int_to_ptr.hbm [resolvable:$true] %s637_s10 }
  0x2a   : > { %v302_v31 = vld [vmem:[%s881_s1] sm:$0xff]  ;;  %v374_v8 = vld [vmem:[%s882_s2 + $0x8] sm:$0xff]  ;;  %s639_s11 = scalar_lea.hbm %s638_s10, 1  ;;  %s643_s23 = scalar_lea.hbm %s883_s3, 2 }
  0x2b   : > { %361 = vmatpush.msra.mxu0 %v308_v25  ;;  %393 = vmatpush.msra.mxu1 %v374_v8  ;;  %v373_v9 = vld [vmem:[%s882_s2] sm:$0xff]  ;;  %p640_p4 = scmp.ne.s32.totalorder %s638_s10, %s639_s11  ;;  %p644_p7 = scmp.lt.s32.totalorder %s638_s10, %s883_s3 }
  0x2c   : > { %p645_p8 = scmp.lt.s32.totalorder %s643_s23, %s639_s11 }
  0x2d   : > { %280 = vadd.xlane.f32.xlu0 %v236_v15  ;;  %362 = vmatpush.msra.mxu0 %v307_v26  ;;  %p641_p5 = pnand %p640_p4, %p780_p9 }
  0x2e   : > { %284 = vadd.xlane.f32.xlu1 %v238_v16  ;;  %394 = vmatpush.msra.mxu1 %v373_v9  ;;  %p646_p10 = por %p645_p8, %p644_p7 }
  0x2f   : > { %288 = vadd.xlane.f32.xlu2 %v240_v17  ;;  %363 = vmatpush.msra.mxu0 %v306_v27  ;;  %p642_p6 = pneg %p641_p5 }
  0x31   : > { %364 = vmatpush.msra.mxu0 %v305_v28  ;;  %p647_p13 = pnand %p646_p10, %p642_p6 }
  0x33   : > { %365 = vmatpush.msra.mxu0 %v304_v29 }
  0x35   : > { %290 = vadd.xlane.f32.xlu0 %v241_v22  ;;  %366 = vmatpush.msra.mxu0 %v303_v30 }
  0x36   : > { %292 = vadd.xlane.f32.xlu1 %v242_v23 }
  0x37   : > { %367 = vmatpush.msra.mxu0 %v302_v31 }
  0x98   : > { %v279_v33 = vpop.xlane.xlu0 %278 }
  0x99   : > { %v283_v34 = vpop.xlane.xlu1 %282  ;;  %v294_v37 = vmul.f32 0.00390625, %v279_v33 }
  0x9a   : > { %v287_v35 = vpop.xlane.xlu2 %286  ;;  %v296_v40 = vmul.f32 0.00390625, %v283_v34 }
  0x9b   : > { %v320_v48 = vperm.slane %v294_v37, %v319_v36  ;;  %v298_v49 = vmul.f32 0.00390625, %v287_v35 }
  0x9c   : > { %v326_v51 = vperm.slane %v296_v40, %v325_v39 }
  0x9d   : > { %v334_v57 = vperm.slane %v298_v49, %v333_v46 }
  0xa0   : > { %v281_v41 = vpop.xlane.xlu0 %280 }
  0xa1   : > { %v295_v43 = vmul.f32 0.00390625, %v281_v41  ;;  %v285_v44 = vpop.xlane.xlu1 %284 }
  0xa2   : > { %v289_v45 = vpop.xlane.xlu2 %288  ;;  %v297_v47 = vmul.f32 0.00390625, %v285_v44 }
  0xa3   : > { %v322_v50 = vperm.slane %v295_v43, %v321_v38  ;;  %v299_v54 = vmul.f32 0.00390625, %v289_v45 }
  0xa4   : > { %v330_v52 = vperm.slane %v297_v47, %v329_v42 }
  0xa5   : > { %v324_v55 = vsel %vm323_vm0, %v322_v50, %v320_v48  ;;  %v338_v60 = vperm.slane %v299_v54, %v337_v53 }
  0xa6   : > { %v328_v56 = vsel %vm327_vm1, %v326_v51, %v324_v55 }
  0xa7   : > { %v332_v58 = vsel %vm331_vm2, %v330_v52, %v328_v56 }
  0xa8   : > { %v291_v61 = vpop.xlane.xlu0 %290  ;;  %v336_v1 = vsel %vm335_vm3, %v334_v57, %v332_v58 }
  0xa9   : > { %v300_v63 = vmul.f32 0.00390625, %v291_v61  ;;  %v293_v0 = vpop.xlane.xlu1 %292  ;;  %v340_v5 = vsel %vm339_vm4, %v338_v60, %v336_v1 }
  0xaa   : > { %v301_v2 = vmul.f32 0.00390625, %v293_v0 }
  0xab   : > { %v342_v3 = vperm.slane %v300_v63, %v341_v59 }
  0xac   : > { %v346_v4 = vperm.slane %v301_v2, %v345_v62 }
  0xad   : > { %v344_v6 = vsel %vm343_vm5, %v342_v3, %v340_v5 }
  0xae   : > { %v348_v7 = vsel %vm347_vm6, %v346_v4, %v344_v6 }
  0xaf   : > { %519 = vmatmul.msk.f32.vlgmr.msra.gmra.mxu0 %vm349_vm7, %v348_v7 }
 0x12c   : > { %v369_v10 = vpop.f32.mrf.mxu0 }
 0x12d   : > { %v372_v11 = vmax.f32 %v369_v10, 0.0 }
 0x12f   : > { %520 = vmatmul.msk.f32.vlgmr.msra.gmra.mxu1 %vm375_vm8, %v372_v11 }
 0x1ac   : > { %v396_v12 = vpop.f32.mrf.mxu1 }
 0x1ad   : > { %v521_v13 = vmul.f32 -1.442695, %v396_v12 }
 0x1af   : > { %589 = vpow2.f32 %v521_v13 }
 0x1b5   : > { %v590_v14 = vpop.eup %589 }
 0x1b6   : > { %v402_v15 = vadd.f32 1.0, %v590_v14 }
 0x1b8   : > { %591 = vrcp.f32 %v402_v15  ;;  %v414_v19 = vand.u32 2147483648, %v402_v15  ;;  %v412_v21 = vand.u32 2147483647, %v402_v15  ;;  %vm408_vm10 = vweird.f32 %v402_v15 }
 0x1ba   : > { %v415_v23 = vor.u32 1.1754944e-38, %v414_v19  ;;  %vm413_vm13 = vcmp.eq.f32.partialorder %v412_v21, 8.507059e+37 }
 0x1be   : > { %v592_v16 = vpop.eup %591 }
 0x1bf   : > { %v404_v17 = vmul.f32 %v592_v16, %v402_v15  ;;  %vm409_vm9 = vweird.f32 %v592_v16 }
 0x1c0   : > { %vm410_vm11 = vmor %vm408_vm10, %vm409_vm9 }
 0x1c1   : > { %v405_v18 = vsub.f32 1.0, %v404_v17 }
 0x1c3   : > { %v406_v20 = vmul.f32 %v592_v16, %v405_v18 }
 0x1c5   : > { %v407_v22 = vadd.f32 %v592_v16, %v406_v20 }
 0x1c7   : > { %v411_v24 = vsel %vm410_vm11, %v592_v16, %v407_v22 }
 0x1c8   : > { %v416_v25 = vsel %vm413_vm13, %v415_v23, %v411_v24 }
 0x1c9   : > { %419 = vst.msk [vmem:[%s205_s7] sm:$0x1] %vm418_vm12, %v416_v25 }
 0x1ca   : > { %650 = shalt.err (!%p647_p13)
}
 0x1cb   : > { %527 = dma.vmem_to_hbm [thread:$0]  (%p780_p9), %s432_s8, 16, %s434_s9, %s421_s15  }
 0x1cc PF: > { %s445_s19 = sand.u32 1, %s685_s12   ;;  %p534_p0 = pnand %p513_p12, %p787_p11 }
 0x1cd   : > { %s446_s24 = scalar_lea.sflag [#allocation5], %s445_s19 }
 0x1ce   : > { %p535_p1 = pneg %p534_p0 }
 0x1d0   : > { %680 = dma.done.wait (%p535_p1), %s446_s24, 16  }
 0x1d1   : > { %682 = vsyncadd (%p535_p1), %s446_s24, 4294967280  ;;  %s19_s17 = sadd.s32 1, %s705_s17   ;;  %s888_s12 = smov %s689_s13 }
 0x1d2   : > { %p16_p2 = scmp.ge.s32.totalorder %s19_s17, 4   ;;  %s889_s13 = smov %s693_s14 }
 0x1d3   : > { %s890_s14 = smov %s785_s26  ;;  %s891_s15 = smov %s701_s16 }
 0x1d4   : > { %s892_s16 = smov %s894_s20  ;;  %18 = sbr.rel (!%p16_p2) target bundleno = 6 (0x6), region = 85 }
 0x1d9   :  { %451 = vsyncpa [#allocation4], 1 }
 0x1da   :  { %453 = vsyncpa [#allocation4 + $0x1], 1 }
 0x1db   :  { %454 = vsyncpa [#allocation5], 1 }
 0x1dc   :  { %456 = vsyncpa [#allocation5 + $0x1], 1 }

</bundles_post_ra>
